<compile_context>
chip_gen: v7x
topology: tpu7x:2x2x1
jax: 0.10.0
libtpu: 0.0.40
codegen_flags: <defaults>
</compile_context>

<pallas_src>
import functools

import jax
import jax.numpy as jnp
import numpy as np
from jax import lax
from jax.experimental import pallas as pl
from jax.experimental.pallas import tpu as pltpu

LOG_STD_MIN = -20.0
LOG_STD_MAX = 2.0
LANE = 128          # TPU lane width: fused head output padded to this width
_TILE_B_CAP = 2048  # per-step footprint is tiny -> fewer, larger grid steps


def actor_kernel(x_ref, w1_ref, b1_ref, w2_ref, b2_ref, wh_ref, bh_ref,
                 out_ref, *, action_dim):
    """One batch tile of the Actor MLP.  Weights arrive bf16, biases f32."""
    x = x_ref[...]  # [tile_b, S] f32

    # Layer 1: Linear + ReLU.  (K = state_dim is tiny; rides along on the MXU.)
    h = jnp.dot(x.astype(jnp.bfloat16), w1_ref[...],
                preferred_element_type=jnp.float32) + b1_ref[...]
    h = jnp.maximum(h, 0.0)

    # Layer 2: Linear + ReLU.  (H x H — the only matmul with meaningful FLOPs.)
    h = jnp.dot(h.astype(jnp.bfloat16), w2_ref[...],
                preferred_element_type=jnp.float32) + b2_ref[...]
    h = jnp.maximum(h, 0.0)

    # Fused, lane-padded heads: ONE matmul -> [tile_b, 128] =
    # [mean_raw | log_std_raw | zero padding].
    y = jnp.dot(h.astype(jnp.bfloat16), wh_ref[...],
                preferred_element_type=jnp.float32) + bh_ref[...]

    # Columns [:A] -> tanh (mean); columns [A:] -> clamp (log_std + zero pad).
    # (jnp.where evaluates both branches on all lanes; tanh/clip are bounded,
    # so this is harmless — documented intentionally.)
    col = lax.broadcasted_iota(jnp.int32, y.shape, dimension=1)
    out_ref[...] = jnp.where(col < action_dim,
                             jnp.tanh(y),
                             jnp.clip(y, LOG_STD_MIN, LOG_STD_MAX))


def _pick_tile_b(B):
    """Batch tile: sublane-aligned, capped, and >= 2 grid steps when B >= 16
    so v7x's two TensorCores both get work."""
    if B < 16:
        return B                      # too small to split; single step
    tile = min(_TILE_B_CAP, B)
    if tile * 2 > B:
        tile = B // 2                 # guarantee at least 2 grid steps
    tile = max(8, (tile // 8) * 8)    # sublane (8) alignment
    return tile


def prepare_actor_params(params, lane_pad=LANE):
    """One-time prep (hoisted out of the per-call hot path):
      * fuse the mean / log_std heads into one [H, A2_pad] weight,
      * zero-pad the fused head to a lane-dense width (multiple of 128),
      * cast matmul weights to bf16 (MXU-native), keep biases f32.
    """
    H = params["w1"].shape[1]
    A = params["wm"].shape[1]
    A2 = 2 * A
    A2_pad = ((A2 + lane_pad - 1) // lane_pad) * lane_pad
    A2_pad = max(A2_pad, lane_pad)

    wh = jnp.concatenate([params["wm"], params["wls"]], axis=1)   # [H, 2A]
    bh = jnp.concatenate([params["bm"], params["bls"]], axis=1)   # [1, 2A]
    wh = jnp.pad(wh, ((0, 0), (0, A2_pad - A2)))                  # [H, 128]
    bh = jnp.pad(bh, ((0, 0), (0, A2_pad - A2)))                  # [1, 128]

    return dict(
        w1=params["w1"].astype(jnp.bfloat16),
        b1=params["b1"].astype(jnp.float32),
        w2=params["w2"].astype(jnp.bfloat16),
        b2=params["b2"].astype(jnp.float32),
        wh=wh.astype(jnp.bfloat16),
        bh=bh.astype(jnp.float32),
        action_dim=int(A),       # python ints: static config, not traced
        head_width=int(A2_pad),
        hidden_dim=int(H),
    )


def actor_forward(state, prep, *, tile_b=None):
    """Run the Actor forward pass as a single Pallas kernel.

    state: [B, S] float32
    prep:  output of prepare_actor_params()
    returns (action_mean [B, A], action_log_std [B, A]) in float32
    """
    B, S = state.shape
    H = prep["hidden_dim"]
    A = prep["action_dim"]
    A2p = prep["head_width"]

    if tile_b is None:
        tile_b = _pick_tile_b(B)
    grid_b = pl.cdiv(B, tile_b)
    B_pad = grid_b * tile_b

    x = state.astype(jnp.float32)
    if B_pad != B:
        # Zero-pad to a tile multiple (no single-giant-block fallback: that
        # path spills vregs, kills pipelining and idles one TC on v7x).
        x = jnp.pad(x, ((0, B_pad - B), (0, 0)))

    # Advisory cost hint for XLA's scheduler around the custom call.
    flops = 2 * B_pad * (S * H + H * H + H * A2p)
    bytes_accessed = (4 * (B_pad * S + B_pad * A2p)      # f32 state + output
                      + 2 * (S * H + H * H + H * A2p)    # bf16 weights
                      + 4 * (2 * H + A2p))               # f32 biases
    cost = pl.CostEstimate(flops=int(flops),
                           transcendentals=int(B_pad * A2p),  # tanh on all lanes
                           bytes_accessed=int(bytes_accessed))

    kernel = functools.partial(actor_kernel, action_dim=A)

    heads = pl.pallas_call(
        kernel,
        out_shape=jax.ShapeDtypeStruct((B_pad, A2p), jnp.float32),
        grid=(grid_b,),
        in_specs=[
            pl.BlockSpec((tile_b, S), lambda i: (i, 0)),   # state: tiled over B
            pl.BlockSpec((S, H), lambda i: (0, 0)),        # weights: resident
            pl.BlockSpec((1, H), lambda i: (0, 0)),
            pl.BlockSpec((H, H), lambda i: (0, 0)),
            pl.BlockSpec((1, H), lambda i: (0, 0)),
            pl.BlockSpec((H, A2p), lambda i: (0, 0)),
            pl.BlockSpec((1, A2p), lambda i: (0, 0)),
        ],
        out_specs=pl.BlockSpec((tile_b, A2p), lambda i: (i, 0)),  # lane-dense
        compiler_params=pltpu.CompilerParams(
            dimension_semantics=(pltpu.PARALLEL,)),
        cost_estimate=cost,
    )(x, prep["w1"], prep["b1"], prep["w2"], prep["b2"], prep["wh"], prep["bh"])

    mean = heads[:B, :A]
    log_std = heads[:B, A:2 * A]
    return mean, log_std


def actor_reference(state, params):
    """Pure-JAX reference mirroring the kernel's bf16-matmul / f32-elementwise path."""
    def bdot(a, b):
        return jnp.dot(a.astype(jnp.bfloat16), b.astype(jnp.bfloat16),
                       preferred_element_type=jnp.float32)

    h = jnp.maximum(bdot(state, params["w1"]) + params["b1"], 0.0)
    h = jnp.maximum(bdot(h, params["w2"]) + params["b2"], 0.0)
    mean = jnp.tanh(bdot(h, params["wm"]) + params["bm"])
    log_std = jnp.clip(bdot(h, params["wls"]) + params["bls"],
                       LOG_STD_MIN, LOG_STD_MAX)
    return mean, log_std


def init_params(key, state_dim, action_dim, hidden_dim):
    """Deterministic synthetic init (uniform, torch-Linear-like scaling)."""
    ks = jax.random.split(key, 8)

    def lin(kw, kb, fan_in, fan_out):
        bound = 1.0 / np.sqrt(fan_in)
        w = jax.random.uniform(kw, (fan_in, fan_out), jnp.float32, -bound, bound)
        b = jax.random.uniform(kb, (1, fan_out), jnp.float32, -bound, bound)
        return w, b

    w1, b1 = lin(ks[0], ks[1], state_dim, hidden_dim)
    w2, b2 = lin(ks[2], ks[3], hidden_dim, hidden_dim)
    wm, bm = lin(ks[4], ks[5], hidden_dim, action_dim)
    wls, bls = lin(ks[6], ks[7], hidden_dim, action_dim)
    return dict(w1=w1, b1=b1, w2=w2, b2=b2, wm=wm, bm=bm, wls=wls, bls=bls)


if __name__ == "__main__":
    # Shapes consistent with the module: state_dim=4, action_dim=2,
    # hidden_dim=256 (module default).  B=64 -> tile_b=32 -> grid=(2,),
    # exercising the pipelined / multi-step path.
    B, S, A, H = 64, 4, 2, 256

    key = jax.random.PRNGKey(0)
    k_state, k_params = jax.random.split(key)
    state = jax.random.normal(k_state, (B, S), dtype=jnp.float32)
    params = init_params(k_params, S, A, H)

    prep = prepare_actor_params(params)        # one-time: fuse / pad / cast
    mean, log_std = actor_forward(state, prep)
    jax.block_until_ready((mean, log_std))

    # Correctness check against the pure-JAX reference (same bf16 matmul path).
    ref_mean, ref_log_std = actor_reference(state, params)
    np.testing.assert_allclose(np.asarray(mean), np.asarray(ref_mean),
                               rtol=1e-2, atol=1e-2)
    np.testing.assert_allclose(np.asarray(log_std), np.asarray(ref_log_std),
                               rtol=1e-2, atol=1e-2)
    assert mean.shape == (B, A) and log_std.shape == (B, A)
    assert np.all(np.asarray(log_std) >= LOG_STD_MIN - 1e-6)
    assert np.all(np.asarray(log_std) <= LOG_STD_MAX + 1e-6)

    # TODO(synk): Actor.sample() uses rsample (reparameterized Normal sampling)
    # and tanh-squashed log_prob; that RNG-driven path is left outside the
    # kernel (could be fused with pltpu.prng_seed / pltpu.stateful_normal to
    # avoid the extra [B, 2A] HBM round trip).
    print("KERNEL_OK")
</pallas_src>

<mosaic_0001>
module attributes {stable_mosaic.version = 11 : i64} {
  func.func @actor_kernel(%arg0: i32, %arg1: memref<32x4xf32, #tpu.memory_space<vmem>>, %arg2: memref<4x256xbf16, #tpu.memory_space<vmem>>, %arg3: memref<1x256xf32, #tpu.memory_space<vmem>>, %arg4: memref<256x256xbf16, #tpu.memory_space<vmem>>, %arg5: memref<1x256xf32, #tpu.memory_space<vmem>>, %arg6: memref<256x128xbf16, #tpu.memory_space<vmem>>, %arg7: memref<1x128xf32, #tpu.memory_space<vmem>>, %arg8: memref<32x128xf32, #tpu.memory_space<vmem>>) attributes {dimension_semantics = [#tpu.dimension_semantics<parallel>], iteration_bounds = array<i64: 2>, scalar_prefetch = 0 : i64, scratch_operands = 0 : i64, tpu.core_type = #tpu.core_type<tc>, window_params = [{transform_indices = @transform_0, window_bounds = array<i64: 32, 4>}, {pipeline_mode = #tpu.pipeline_mode<synchronous>, transform_indices = @transform_1, window_bounds = array<i64: 4, 256>}, {pipeline_mode = #tpu.pipeline_mode<synchronous>, transform_indices = @transform_2, window_bounds = array<i64: 1, 256>}, {pipeline_mode = #tpu.pipeline_mode<synchronous>, transform_indices = @transform_3, window_bounds = array<i64: 256, 256>}, {pipeline_mode = #tpu.pipeline_mode<synchronous>, transform_indices = @transform_4, window_bounds = array<i64: 1, 256>}, {pipeline_mode = #tpu.pipeline_mode<synchronous>, transform_indices = @transform_5, window_bounds = array<i64: 256, 128>}, {pipeline_mode = #tpu.pipeline_mode<synchronous>, transform_indices = @transform_6, window_bounds = array<i64: 1, 128>}, {transform_indices = @transform_7, window_bounds = array<i64: 32, 128>}]} {
    %c0 = arith.constant 0 : index
    %c0_0 = arith.constant 0 : index
    %0 = vector.load %arg1[%c0, %c0_0] : memref<32x4xf32, #tpu.memory_space<vmem>>, vector<32x4xf32>
    %1 = arith.truncf %0 : vector<32x4xf32> to vector<32x4xbf16>
    %c0_1 = arith.constant 0 : index
    %c0_2 = arith.constant 0 : index
    %2 = vector.load %arg2[%c0_1, %c0_2] : memref<4x256xbf16, #tpu.memory_space<vmem>>, vector<4x256xbf16>
    %cst = arith.constant dense<0.000000e+00> : vector<32x256xf32>
    %3 = tpu.matmul %1, %2, %cst {dimension_numbers = #tpu.dot_dimension_numbers<[1], [0], [0], [1], [0, 0, 1, 1], [], []>} : vector<32x4xbf16>, vector<4x256xbf16>, vector<32x256xf32> -> vector<32x256xf32>
    %c0_3 = arith.constant 0 : index
    %c0_4 = arith.constant 0 : index
    %4 = vector.load %arg3[%c0_3, %c0_4] : memref<1x256xf32, #tpu.memory_space<vmem>>, vector<1x256xf32>
    %5 = vector.broadcast %4 : vector<1x256xf32> to vector<32x256xf32>
    %6 = arith.addf %3, %5 : vector<32x256xf32>
    %cst_5 = arith.constant 0.000000e+00 : f32
    %7 = vector.broadcast %cst_5 : f32 to vector<32x256xf32>
    %8 = arith.maximumf %6, %7 : vector<32x256xf32>
    %9 = arith.truncf %8 : vector<32x256xf32> to vector<32x256xbf16>
    %c0_6 = arith.constant 0 : index
    %c0_7 = arith.constant 0 : index
    %10 = vector.load %arg4[%c0_6, %c0_7] : memref<256x256xbf16, #tpu.memory_space<vmem>>, vector<256x256xbf16>
    %cst_8 = arith.constant dense<0.000000e+00> : vector<32x256xf32>
    %11 = tpu.matmul %9, %10, %cst_8 {dimension_numbers = #tpu.dot_dimension_numbers<[1], [0], [0], [1], [0, 0, 1, 1], [], []>} : vector<32x256xbf16>, vector<256x256xbf16>, vector<32x256xf32> -> vector<32x256xf32>
    %c0_9 = arith.constant 0 : index
    %c0_10 = arith.constant 0 : index
    %12 = vector.load %arg5[%c0_9, %c0_10] : memref<1x256xf32, #tpu.memory_space<vmem>>, vector<1x256xf32>
    %13 = vector.broadcast %12 : vector<1x256xf32> to vector<32x256xf32>
    %14 = arith.addf %11, %13 : vector<32x256xf32>
    %cst_11 = arith.constant 0.000000e+00 : f32
    %15 = vector.broadcast %cst_11 : f32 to vector<32x256xf32>
    %16 = arith.maximumf %14, %15 : vector<32x256xf32>
    %17 = arith.truncf %16 : vector<32x256xf32> to vector<32x256xbf16>
    %c0_12 = arith.constant 0 : index
    %c0_13 = arith.constant 0 : index
    %18 = vector.load %arg6[%c0_12, %c0_13] : memref<256x128xbf16, #tpu.memory_space<vmem>>, vector<256x128xbf16>
    %cst_14 = arith.constant dense<0.000000e+00> : vector<32x128xf32>
    %19 = tpu.matmul %17, %18, %cst_14 {dimension_numbers = #tpu.dot_dimension_numbers<[1], [0], [0], [1], [0, 0, 1, 1], [], []>} : vector<32x256xbf16>, vector<256x128xbf16>, vector<32x128xf32> -> vector<32x128xf32>
    %c0_15 = arith.constant 0 : index
    %c0_16 = arith.constant 0 : index
    %20 = vector.load %arg7[%c0_15, %c0_16] : memref<1x128xf32, #tpu.memory_space<vmem>>, vector<1x128xf32>
    %21 = vector.broadcast %20 : vector<1x128xf32> to vector<32x128xf32>
    %22 = arith.addf %19, %21 : vector<32x128xf32>
    %23 = tpu.iota {dimensions = array<i32: 1>} : vector<32x128xi32>
    %c2_i32 = arith.constant 2 : i32
    %24 = vector.broadcast %c2_i32 : i32 to vector<32x128xi32>
    %25 = arith.cmpi slt, %23, %24 : vector<32x128xi32>
    %26 = math.tanh %22 : vector<32x128xf32>
    %cst_17 = arith.constant -2.000000e+01 : f32
    %cst_18 = arith.constant 2.000000e+00 : f32
    %27 = vector.broadcast %cst_17 : f32 to vector<32x128xf32>
    %28 = arith.maximumf %27, %22 : vector<32x128xf32>
    %29 = vector.broadcast %cst_18 : f32 to vector<32x128xf32>
    %30 = arith.minimumf %29, %28 : vector<32x128xf32>
    %31 = arith.select %25, %26, %30 : vector<32x128xi1>, vector<32x128xf32>
    %c0_19 = arith.constant 0 : index
    %c0_20 = arith.constant 0 : index
    %32 = vector.load %arg8[%c0_19, %c0_20] : memref<32x128xf32, #tpu.memory_space<vmem>>, vector<32x128xf32>
    tpu.vector_store %arg8[%c0_19, %c0_20], %31 {strides = array<i32>} : memref<32x128xf32, #tpu.memory_space<vmem>>, vector<32x128xf32>,
    return
  }
  func.func @transform_0(%arg0: i32) -> (i32, i32) {
    %c0_i32 = arith.constant 0 : i32
    %c0_i32_0 = arith.constant 0 : i32
    return %arg0, %c0_i32 : i32, i32
  }
  func.func @transform_1(%arg0: i32) -> (i32, i32) {
    %c0_i32 = arith.constant 0 : i32
    %c0_i32_0 = arith.constant 0 : i32
    %c0_i32_1 = arith.constant 0 : i32
    return %c0_i32, %c0_i32_0 : i32, i32
  }
  func.func @transform_2(%arg0: i32) -> (i32, i32) {
    %c0_i32 = arith.constant 0 : i32
    %c0_i32_0 = arith.constant 0 : i32
    %c0_i32_1 = arith.constant 0 : i32
    return %c0_i32, %c0_i32_0 : i32, i32
  }
  func.func @transform_3(%arg0: i32) -> (i32, i32) {
    %c0_i32 = arith.constant 0 : i32
    %c0_i32_0 = arith.constant 0 : i32
    %c0_i32_1 = arith.constant 0 : i32
    return %c0_i32, %c0_i32_0 : i32, i32
  }
  func.func @transform_4(%arg0: i32) -> (i32, i32) {
    %c0_i32 = arith.constant 0 : i32
    %c0_i32_0 = arith.constant 0 : i32
    %c0_i32_1 = arith.constant 0 : i32
    return %c0_i32, %c0_i32_0 : i32, i32
  }
  func.func @transform_5(%arg0: i32) -> (i32, i32) {
    %c0_i32 = arith.constant 0 : i32
    %c0_i32_0 = arith.constant 0 : i32
    %c0_i32_1 = arith.constant 0 : i32
    return %c0_i32, %c0_i32_0 : i32, i32
  }
  func.func @transform_6(%arg0: i32) -> (i32, i32) {
    %c0_i32 = arith.constant 0 : i32
    %c0_i32_0 = arith.constant 0 : i32
    %c0_i32_1 = arith.constant 0 : i32
    return %c0_i32, %c0_i32_0 : i32, i32
  }
  func.func @transform_7(%arg0: i32) -> (i32, i32) {
    %c0_i32 = arith.constant 0 : i32
    %c0_i32_0 = arith.constant 0 : i32
    return %arg0, %c0_i32 : i32, i32
  }
}

</mosaic_0001>

<bundles_post_ra>
// kernel: tpu_custom_call.1
= control target key start
LH: loop header
LB: loop body
LE: loop exit
PB: predicated region body
PF: predicated region fallthrough
CT: control target
= control target key end

     0   :  { %12 = vsyncpa [#allocation3], 0  ;;  %s1605_s0 = inlined_call_operand.vmem [shape: f32[64,4], index: 0, kind: input, shape index: {}]   ;;  %s1606_s1 = inlined_call_operand.vmem [shape: bf16[4,256], index: 1, kind: input, shape index: {}]   ;;  %s1607_s2 = inlined_call_operand.vmem [shape: f32[1,256], index: 2, kind: input, shape index: {}]   ;;  %s1608_s3 = inlined_call_operand.hbm [shape: bf16[256,256], index: 3, kind: input, shape index: {}]   ;;  %s1609_s4 = inlined_call_operand.vmem [shape: f32[1,256], index: 4, kind: input, shape index: {}]   ;;  %s1610_s5 = inlined_call_operand.hbm [shape: bf16[256,128], index: 5, kind: input, shape index: {}]   ;;  %s1611_s6 = inlined_call_operand.vmem [shape: f32[1,128], index: 6, kind: input, shape index: {}]   ;;  %s1612_s7 = inlined_call_operand.hbm [shape: f32[64,128], index: 7, kind: output, shape index: {}]  }
   0x1   :  { %13 = vsyncpa [#allocation6], 0 }
   0x2   :  { %14 = vsyncpa [#allocation4], 0 }
   0x3   :  { %16 = vsyncpa [#allocation4 + $0x1], 0  ;;  %s1407_s24 = smov 0   ;;  %s1409_s25 = smov 0  }
   0x4   :  { %s1411_s26 = smov 0   ;;  %s1413_s27 = smov 0  }
   0x5 LB: > { %s1428_s28 = sadd.s32 4294967295, %s1355_s27   ;;  %s992_s29 = sadd.s32 4294967294, %s1355_s27   ;;  %s1355_s27 = sphi %s1413_s27, %s1632_s27   ;;  %s1351_s26 = sphi %s1411_s26, %s1631_s26   ;;  %s1347_s25 = sphi %s1409_s25, %s1630_s25   ;;  %s1343_s24 = sphi %s1407_s24, %s1629_s24  }
   0x6   : > { %s1432_s30 = sadd.s32 1, %s1355_s27   ;;  %s181_s8 = sadd.s32 1, %s1351_s26 }
   0x7   : > { %s178_s9 = ssub.s32 %s1355_s27, %s1432_s30  ;;  %p191_p0 = scmp.ne.s32.totalorder %s1351_s26, %s1347_s25 }
   0x8   : > { %p179_p1 = scmp.eq.s32.totalorder %s178_s9, 0  ;;  %p192_p2 = scmp.eq.s32.totalorder %s1428_s28, 1 }
   0x9   : > { %p197_p3 = scmp.ne.s32.totalorder %s1347_s25, %s1343_s24  ;;  %p198_p4 = scmp.eq.s32.totalorder %s992_s29, 1 }
   0xa   : > { %s1443_s10 = scalar_select %p179_p1, %s1351_s26, %s181_s8  }
   0xb   : > { %p1445_p5 = por %p192_p2, %p191_p0  ;;  %p1449_p6 = por %p198_p4, %p197_p3 }
   0xc   : > { %1616 = sst [smem:[#allocation11_spill]] %s1443_s10  ;;  %p993_p7 = scmp.ge.s32.totalorder %s1355_s27, 1 }
   0xd   : > { %s1617_s11 = scalar_select %p1445_p5, 1, 0 }
   0xe   : > { %s1618_s12 = scalar_select %p1449_p6, 1, 0 }
   0xf   : > { %p205_p8 = scmp.lt.s32.totalorder %s1355_s27, 3  ;;  %p1613_p9 = scmp.eq.s32.totalorder %s1428_s28, 0 }
  0x10   : > { %s1357_s14 = smov [#allocation2]   ;;  %s1358_s17 = smov [#allocation5]  }
  0x11   : > { %p1456_p10 = pnand %p993_p7, %p205_p8  ;;  %s223_s15 = sshll.u32 %s1357_s14, 4  ;;  %s224_s15 = int_to_ptr.vmem [resolvable:$true] %s223_s15 }
  0x12   : > { %s239_s18 = sshll.u32 %s1358_s17, 4  ;;  %s1229_s21 = scalar_lea.hbm %s1608_s3, 4096  ;;  %s1468_s18 = int_to_ptr.vmem [resolvable:$true] %s239_s18 }
  0x13   : > { %s1619_s13 = scalar_select %p1456_p10, 1, 0 }
  0x14   : > { %p1100_p11 = pneg %p1456_p10  ;;  %p1230_p13 = scmp.ne.s32.totalorder %s1608_s3, %s1229_s21 }
  0x15   : > { %p1236_p3 = scmp.lt.u32.totalorder %s1229_s21, %s1608_s3 }
  0x16   : > { %p1464_p12 = pnand %p1613_p9, %p1100_p11 }
  0x18   : > { %p1231_p0 = pneg %p1464_p12 }
  0x1a   : > { %p1232_p1 = pnand %p1231_p0, %p1230_p13 }
  0x1c   : > { %p1233_p2 = pneg %p1232_p1 }
  0x1e   : > { %p1238_p4 = pnand %p1236_p3, %p1233_p2 }
  0x20   : > { %1241 = shalt.err (!%p1238_p4)
}
  0x21   : > { %s1242_s9 = scalar_lea.vmem %s224_s15, 4096  ;;  %p1250_p9 = scmp.lt.s32.totalorder %s224_s15, %s224_s15 }
  0x22   : > { %p1243_p7 = scmp.ne.s32.totalorder %s224_s15, %s1242_s9  ;;  %p1251_p6 = scmp.lt.s32.totalorder %s1242_s9, %s1242_s9 }
  0x24   : > { %p1245_p8 = pnand %p1243_p7, %p1231_p0  ;;  %p1252_p5 = por %p1251_p6, %p1250_p9 }
  0x26   : > { %p1246_p11 = pneg %p1245_p8 }
  0x28   : > { %p1253_p10 = pnand %p1252_p5, %p1246_p11 }
  0x2a   : > { %1256 = shalt.err (!%p1253_p10)
}
  0x2b   : > { %s1359_s14 = smov 128   ;;  %s1360_s17 = smov 8  }
  0x2c   : > { %1103 = dma.hbm_to_vmem [thread:$0]  (!%p1464_p12), %s1608_s3, 4096, %s224_s15, [#allocation3], %s1359_s14, %s1359_s14, %s1360_s17  }
  0x2d   : > { %s1257_s23 = scalar_lea.hbm %s1610_s5, 2048 }
  0x2e   : > { %p1258_p13 = scmp.ne.s32.totalorder %s1610_s5, %s1257_s23  ;;  %p1264_p9 = scmp.lt.u32.totalorder %s1257_s23, %s1610_s5 }
  0x30   : > { %p1260_p5 = pnand %p1258_p13, %p1231_p0 }
  0x32   : > { %p1261_p6 = pneg %p1260_p5 }
  0x34   : > { %p1266_p10 = pnand %p1264_p9, %p1261_p6 }
  0x36   : > { %1269 = shalt.err (!%p1266_p10)
}
  0x37   : > { %s1270_s15 = scalar_lea.vmem %s1468_s18, 2048  ;;  %p1278_p4 = scmp.lt.s32.totalorder %s1468_s18, %s1468_s18 }
  0x38   : > { %p1271_p1 = scmp.ne.s32.totalorder %s1468_s18, %s1270_s15  ;;  %p1279_p7 = scmp.lt.s32.totalorder %s1270_s15, %s1270_s15 }
  0x3a   : > { %p1273_p2 = pnand %p1271_p1, %p1231_p0  ;;  %p1280_p8 = por %p1279_p7, %p1278_p4 }
  0x3c   : > { %p1274_p3 = pneg %p1273_p2 }
  0x3e   : > { %p1281_p11 = pnand %p1280_p8, %p1274_p3 }
  0x40   : > { %1284 = shalt.err (!%p1281_p11)
}
  0x41   : > { %s1361_s10 = smov 64   ;;  %s1362_s14 = smov 4  }
  0x42   : > { %1106 = dma.hbm_to_vmem [thread:$0]  (!%p1464_p12), %s1610_s5, 2048, %s1468_s18, [#allocation6], %s1361_s10, %s1361_s10, %s1362_s14  }
  0x43   : > { %p1621_p13 = scmp.ne.s32.totalorder %s1619_s13, 0 }
  0x44   : > { %p1622_p0 = scmp.eq.s32.totalorder (!%p1621_p13), %s1428_s28, 0 }
  0x45   : > { %267 = sbr.rel (%p1621_p13) target bundleno = 787 (0x313), region = 48 }
  0x4c   : > { %1330 = dma.done.wait (%p1622_p0), [#allocation3], 4096   ;;  %p1623_p5 = pmov %p1622_p0 }
  0x4d   : > { %p1624_p6 = pmov %p1622_p0 }
  0x4e   : > { %1332 = vsyncadd (%p1623_p5), [#allocation3], 4294963200 }
  0x4f   : > { %1334 = dma.done.wait (%p1624_p6), [#allocation6], 2048   ;;  %p1625_p9 = pmov %p1622_p0 }
  0x50   : > { %s1001_s16 = sshll.u32 %s1428_s28, 2  ;;  %v1363_v0 = vmov 0   ;;  %vm346_vm0 = vcmask 1041408   ;;  %v1157_v6 = vld [vmem:[#allocation2 + $0x4] ss:$8 sps:$4 sm:$0xff]   ;;  %vm339_vm1 = vcmask 31744   ;;  %v320_v53 = vlaneseq }
  0x51   : > { %1336 = vsyncadd (%p1625_p9), [#allocation6], 4294965248  ;;  %385 = vmatprep.mubr.bf16.mxu0 %v1363_v0  ;;  %p304_p12 = scmp.lt.s32.totalorder %s1001_s16, 7  ;;  %v1159_v7 = vld [vmem:[#allocation2] ss:$8 sps:$4 sm:$0xff]   ;;  %622 = vmatprep.subr.bf16.mxu1 %v1157_v6  ;;  %v1209_v46 = vld [vmem:[#allocation5 + $0x50] sm:$0xff]  }
  0x52   : > { %v1003_v1 = vld.sshfl [vmem:[%s1606_s1] sm:$0x33 pattern:$0x76325410]  ;;  %v1160_v9 = vld [vmem:[#allocation2 + $0x14] ss:$8 sps:$4 sm:$0xff]   ;;  %623 = vmatpush1.bf16.msra.mxu1 %v1159_v7 }
  0x53   : > { %s1634_s16 = smov (!%p304_p12, %s1001_s16), 7  ;;  %v338_v4 = vcombine.high %v1003_v1, %v1003_v1  ;;  %v348_v5 = vsel %vm346_vm0, %v1003_v1, 0  ;;  %v1162_v10 = vld [vmem:[#allocation2 + $0x10] ss:$8 sps:$4 sm:$0xff]   ;;  %624 = vmatprep.subr.bf16.mxu1 %v1160_v9  ;;  %v1163_v11 = vld [vmem:[#allocation2 + $0x24] ss:$8 sps:$4 sm:$0xff]  }
  0x54   : > { %s1002_s13 = sshll.u32 %s1634_s16, 3  ;;  %v1165_v14 = vld [vmem:[#allocation2 + $0x20] ss:$8 sps:$4 sm:$0xff]   ;;  %v1166_v15 = vld [vmem:[#allocation2 + $0x34] ss:$8 sps:$4 sm:$0xff]   ;;  %v321_v54 = vshrl.u32 %v320_v53, 7 }
  0x55   : > { %s307_s21 = scalar_lea.vmem %s1605_s0, %s1002_s13  ;;  %1004 = vmatprep.subr.msk.bf16.mxu0 %vm346_vm0, %v338_v4  ;;  %v1168_v17 = vld [vmem:[#allocation2 + $0x30] ss:$8 sps:$4 sm:$0xff]   ;;  %v1169_v18 = vld [vmem:[#allocation2 + $0x44] ss:$8 sps:$4 sm:$0xff]   ;;  %v1171_v19 = vld [vmem:[#allocation2 + $0x40] ss:$8 sps:$4 sm:$0xff]  }
  0x56   : > { %v311_v2 = vld [vmem:[%s307_s21] sm:$0xff]  ;;  %v312_v3 = vld [vmem:[%s307_s21 + $0x8] sm:$0xff]  ;;  %354 = vmatpush1.bf16.msra.mxu0 %v348_v5  ;;  %v313_v12 = vld [vmem:[%s307_s21 + $0x10] sm:$0xff]  ;;  %625 = vmatpush1.bf16.msra.mxu1 %v1162_v10  ;;  %v322_v55 = vsub.s32 0, %v321_v54  ;;  %v326_v57 = vsub.s32 1, %v321_v54  ;;  %s300_s17 = sand.u32 1, %s1347_s25  }
  0x57   : > { %v315_v8 = vpack.c.bf16 %v312_v3, %v311_v2  ;;  %v314_v13 = vld [vmem:[%s307_s21 + $0x18] sm:$0xff]  ;;  %626 = vmatprep.subr.bf16.mxu1 %v1163_v11  ;;  %v1175_v22 = vld [vmem:[#allocation2 + $0x64] ss:$8 sps:$4 sm:$0xff]   ;;  %v1177_v23 = vld [vmem:[#allocation2 + $0x60] ss:$8 sps:$4 sm:$0xff]   ;;  %s1000_s19 = sshll.u32 %s300_s17, 5 }
  0x58   : > { %v316_v16 = vpack.c.bf16 %v314_v13, %v313_v12  ;;  %v1172_v20 = vld [vmem:[#allocation2 + $0x54] ss:$8 sps:$4 sm:$0xff]   ;;  %v1174_v21 = vld [vmem:[#allocation2 + $0x50] ss:$8 sps:$4 sm:$0xff]   ;;  %v1181_v26 = vld [vmem:[#allocation2 + $0x84] ss:$8 sps:$4 sm:$0xff]  }
  0x59   : > { %1005 = vmatmul.mubr.msk.bf16.vlgmr.msra.gmra.mrb[0].mxu0 %vm339_vm1, %v315_v8  ;;  %v1178_v24 = vld [vmem:[#allocation2 + $0x74] ss:$8 sps:$4 sm:$0xff]   ;;  %v1180_v25 = vld [vmem:[#allocation2 + $0x70] ss:$8 sps:$4 sm:$0xff]   ;;  %v1183_v27 = vld [vmem:[#allocation2 + $0x80] ss:$8 sps:$4 sm:$0xff]  }
  0x5a   : > { %395 = vmatprep.mubr.bf16.mxu0 %v1363_v0  ;;  %627 = vmatpush1.bf16.msra.mxu1 %v1165_v14  ;;  %v1184_v28 = vld [vmem:[#allocation2 + $0x94] ss:$8 sps:$4 sm:$0xff]   ;;  %v1186_v29 = vld [vmem:[#allocation2 + $0x90] ss:$8 sps:$4 sm:$0xff]   ;;  %v1187_v30 = vld [vmem:[#allocation2 + $0xa4] ss:$8 sps:$4 sm:$0xff]  }
  0x5b   : > { %628 = vmatprep.subr.bf16.mxu1 %v1166_v15  ;;  %v1189_v31 = vld [vmem:[#allocation2 + $0xa0] ss:$8 sps:$4 sm:$0xff]   ;;  %v1190_v32 = vld [vmem:[#allocation2 + $0xb4] ss:$8 sps:$4 sm:$0xff]   ;;  %v1192_v33 = vld [vmem:[#allocation2 + $0xb0] ss:$8 sps:$4 sm:$0xff]  }
  0x5c   : > { %v1193_v34 = vld [vmem:[#allocation2 + $0xc4] ss:$8 sps:$4 sm:$0xff]   ;;  %v1195_v35 = vld [vmem:[#allocation2 + $0xc0] ss:$8 sps:$4 sm:$0xff]   ;;  %v1196_v36 = vld [vmem:[#allocation2 + $0xd4] ss:$8 sps:$4 sm:$0xff]  }
  0x5d   : > { %v1198_v37 = vld [vmem:[#allocation2 + $0xd0] ss:$8 sps:$4 sm:$0xff]   ;;  %v1199_v38 = vld [vmem:[#allocation2 + $0xe4] ss:$8 sps:$4 sm:$0xff]   ;;  %v1201_v39 = vld [vmem:[#allocation2 + $0xe0] ss:$8 sps:$4 sm:$0xff]  }
  0x5e   : > { %629 = vmatpush1.bf16.msra.mxu1 %v1168_v17  ;;  %v1202_v40 = vld [vmem:[#allocation2 + $0xf4] ss:$8 sps:$4 sm:$0xff]   ;;  %v1204_v41 = vld [vmem:[#allocation2 + $0xf0] ss:$8 sps:$4 sm:$0xff]   ;;  %v1205_v42 = vld [vmem:[#allocation5 + $0x40] sm:$0xff]   ;;  %s302_s16 = scalar_lea.vmem [#allocation7], %s1000_s19 }
  0x5f   : > { %630 = vmatprep.subr.bf16.mxu1 %v1169_v18  ;;  %v1206_v43 = vld [vmem:[#allocation5] sm:$0xff]   ;;  %v1207_v44 = vld [vmem:[#allocation5 + $0x48] sm:$0xff]   ;;  %1062 = vmatprep.subr.bf16.mxu0 %v1205_v42  ;;  %v1210_v47 = vld [vmem:[#allocation5 + $0x10] sm:$0xff]   ;;  %s908_s13 = sshll.u32 %s302_s16, 4  ;;  %s1061_s18 = sshll.u32 %s1428_s28, 9  ;;  %s1559_s13 = int_to_ptr.vmem [resolvable:$true] %s908_s13 }
  0x60   : > { %1063 = vmatpush3.bf16.msra.mxu0 %v1206_v43  ;;  %v1208_v45 = vld [vmem:[#allocation5 + $0x8] sm:$0xff]   ;;  %v1211_v48 = vld [vmem:[#allocation5 + $0x58] sm:$0xff]   ;;  %v1213_v50 = vld [vmem:[#allocation5 + $0x60] sm:$0xff]   ;;  %s1557_s22 = scalar_lea.hbm %s1612_s7, %s1061_s18  ;;  %s1564_s28 = scalar_lea.sflag [#allocation4], %s300_s17 }
  0x61   : > { %1006 = vmatmul.mubr.msk.bf16.gmra.mrb[4].mxu0 %vm339_vm1, %v316_v16  ;;  %1064 = vmatprep.subr.bf16.mxu0 %v1207_v44  ;;  %v1212_v49 = vld [vmem:[#allocation5 + $0x18] sm:$0xff]   ;;  %v1214_v51 = vld [vmem:[#allocation5 + $0x20] sm:$0xff]   ;;  %v1215_v52 = vld [vmem:[#allocation5 + $0x68] sm:$0xff]   ;;  %s1285_s23 = scalar_lea.vmem %s1559_s13, 512  ;;  %p1626_p1 = scmp.ne.s32.totalorder %s1617_s11, 0 }
  0x62   : > { %631 = vmatpush1.bf16.msra.mxu1 %v1171_v19  ;;  %v318_v56 = vld [vmem:[%s1607_s2] sm:$0x3]  ;;  %p1286_p10 = scmp.ne.s32.totalorder %s1559_s13, %s1285_s23  ;;  %s1364_s29 = smov [#allocation7]  }
  0x63   : > { %632 = vmatprep.subr.bf16.mxu1 %v1172_v20  ;;  %v323_v58 = vrot.slane %v318_v56, %v322_v55  ;;  %v327_v59 = vrot.slane %v318_v56, %v326_v57  ;;  %s1289_s8 = sshll.u32 %s1364_s29, 4  ;;  %s1290_s8 = int_to_ptr.vmem [resolvable:$false] %s1289_s8 }
  0x64   : > { %1065 = vmatpush3.bf16.msra.mxu0 %v1208_v45  ;;  %p1287_p2 = pnand %p1286_p10, %p1626_p1  ;;  %s1291_s9 = scalar_lea.vmem %s1290_s8, 1024 }
  0x65   : > { %1066 = vmatprep.subr.bf16.mxu0 %v1209_v46  ;;  %p1292_p4 = scmp.lt.s32.totalorder %s1559_s13, %s1290_s8  ;;  %p1293_p7 = scmp.lt.s32.totalorder %s1291_s9, %s1285_s23 }
  0x66   : > { %633 = vmatpush1.bf16.msra.mxu1 %v1174_v21  ;;  %p1288_p3 = pneg %p1287_p2 }
  0x67   : > { %634 = vmatprep.subr.bf16.mxu1 %v1175_v22  ;;  %p1294_p8 = por %p1293_p7, %p1292_p4 }
  0x68   : > { %1067 = vmatpush3.bf16.msra.mxu0 %v1210_v47 }
  0x69   : > { %1068 = vmatprep.subr.bf16.mxu0 %v1211_v48  ;;  %p1295_p11 = pnand %p1294_p8, %p1288_p3 }
  0x6a   : > { %635 = vmatpush1.bf16.msra.mxu1 %v1177_v23 }
  0x6b   : > { %636 = vmatprep.subr.bf16.mxu1 %v1178_v24  ;;  %v1216_v24 = vld [vmem:[#allocation5 + $0x28] sm:$0xff]  }
  0x6c   : > { %1069 = vmatpush3.bf16.msra.mxu0 %v1212_v49 }
  0x6d   : > { %1070 = vmatprep.subr.bf16.mxu0 %v1213_v50 }
  0x6e   : > { %637 = vmatpush1.bf16.msra.mxu1 %v1180_v25  ;;  %v1217_v25 = vld [vmem:[#allocation5 + $0x70] sm:$0xff]  }
  0x6f   : > { %638 = vmatprep.subr.bf16.mxu1 %v1181_v26  ;;  %v1218_v26 = vld [vmem:[#allocation5 + $0x30] sm:$0xff]  }
  0x70   : > { %1071 = vmatpush3.bf16.msra.mxu0 %v1214_v51 }
  0x71   : > { %1072 = vmatprep.subr.bf16.mxu0 %v1215_v52 }
  0x72   : > { %639 = vmatpush1.bf16.msra.mxu1 %v1183_v27  ;;  %v1219_v27 = vld [vmem:[#allocation5 + $0x78] sm:$0xff]  }
  0x73   : > { %640 = vmatprep.subr.bf16.mxu1 %v1184_v28  ;;  %v1220_v28 = vld [vmem:[#allocation5 + $0x38] sm:$0xff]  }
  0x74   : > { %1073 = vmatpush3.bf16.msra.mxu0 %v1216_v24 }
  0x75   : > { %1074 = vmatprep.subr.bf16.mxu0 %v1217_v25 }
  0x76   : > { %641 = vmatpush1.bf16.msra.mxu1 %v1186_v29  ;;  %v450_v29 = vld [vmem:[%s1609_s4] sm:$0x3] }
  0x77   : > { %642 = vmatprep.subr.bf16.mxu1 %v1187_v30  ;;  %v455_v30 = vrot.slane %v450_v29, %v322_v55 }
  0x78   : > { %1075 = vmatpush3.bf16.msra.mxu0 %v1218_v26 }
  0x79   : > { %1076 = vmatprep.subr.bf16.mxu0 %v1219_v27 }
  0x7a   : > { %643 = vmatpush1.bf16.msra.mxu1 %v1189_v31  ;;  %v459_v31 = vrot.slane %v450_v29, %v326_v57 }
  0x7b   : > { %644 = vmatprep.subr.bf16.mxu1 %v1190_v32 }
  0x7c   : > { %1077 = vmatpush3.bf16.msra.mxu0 %v1220_v28 }
  0x7e   : > { %645 = vmatpush1.bf16.msra.mxu1 %v1192_v33 }
  0x7f   : > { %646 = vmatprep.subr.bf16.mxu1 %v1193_v34 }
  0x82   : > { %647 = vmatpush1.bf16.msra.mxu1 %v1195_v35 }
  0x83   : > { %648 = vmatprep.subr.bf16.mxu1 %v1196_v36 }
  0x86   : > { %649 = vmatpush1.bf16.msra.mxu1 %v1198_v37 }
  0x87   : > { %650 = vmatprep.subr.bf16.mxu1 %v1199_v38 }
  0x8a   : > { %651 = vmatpush1.bf16.msra.mxu1 %v1201_v39 }
  0x8b   : > { %652 = vmatprep.subr.bf16.mxu1 %v1202_v40 }
  0x8e   : > { %653 = vmatpush1.bf16.msra.mxu1 %v1204_v41 }
 0x12c   : > { %v387_v60 = vpop.f32.mrb[0].mxu0 }
 0x12d   : > { %v388_v61 = vadd.f32 %v387_v60, %v323_v58  ;;  %v389_v62 = vpop.f32.mrb[1].mxu0 }
 0x12e   : > { %v390_v63 = vadd.f32 %v389_v62, %v327_v59  ;;  %v391_v0 = vpop.f32.mrb[2].mxu0  ;;  %v1039_v62 = vld [vmem:[%s1611_s6] ss:$0 sm:$0xff] }
 0x12f   : > { %v392_v1 = vadd.f32 %v391_v0, %v323_v58  ;;  %v393_v2 = vpop.f32.mrb[3].mxu0  ;;  %v406_v4 = vmax.f32 %v388_v61, 0.0 }
 0x130   : > { %v394_v3 = vadd.f32 %v393_v2, %v327_v59  ;;  %v407_v6 = vmax.f32 %v390_v63, 0.0 }
 0x131   : > { %v408_v5 = vmax.f32 %v392_v1, 0.0 }
 0x132   : > { %v409_v7 = vmax.f32 %v394_v3, 0.0 }
 0x133   : > { %v414_v8 = vpack.c.bf16 %v408_v5, %v406_v4 }
 0x134   : > { %v397_v9 = vpop.f32.mrb[4].mxu0  ;;  %v415_v10 = vpack.c.bf16 %v409_v7, %v407_v6 }
 0x135   : > { %v398_v11 = vadd.f32 %v397_v9, %v323_v58  ;;  %v399_v12 = vpop.f32.mrb[5].mxu0 }
 0x136   : > { %v400_v13 = vadd.f32 %v399_v12, %v327_v59  ;;  %v401_v14 = vpop.f32.mrb[6].mxu0  ;;  %654 = vmatprep.mubr.bf16.mxu1 %v415_v10 }
 0x137   : > { %v402_v15 = vadd.f32 %v401_v14, %v323_v58  ;;  %v403_v16 = vpop.f32.mrb[7].mxu0  ;;  %655 = vmatmul.mubr.bf16.vlgmr.msra.gmra.mrb[0].mxu1 %v414_v8  ;;  %v410_v18 = vmax.f32 %v398_v11, 0.0  ;;  %v872_v8 = vand.u32 127, %v320_v53 }
 0x138   : > { %v404_v17 = vadd.f32 %v403_v16, %v327_v59  ;;  %v411_v20 = vmax.f32 %v400_v13, 0.0 }
 0x139   : > { %v412_v19 = vmax.f32 %v402_v15, 0.0  ;;  %vm873_vm2 = vcmp.lt.s32.totalorder %v872_v8, 2 }
 0x13a   : > { %v413_v21 = vmax.f32 %v404_v17, 0.0 }
 0x13b   : > { %v416_v22 = vpack.c.bf16 %v412_v19, %v410_v18 }
 0x13c   : > { %v417_v23 = vpack.c.bf16 %v413_v21, %v411_v20 }
 0x13e   : > { %664 = vmatprep.mubr.bf16.mxu1 %v417_v23 }
 0x13f   : > { %665 = vmatmul.mubr.bf16.gmra.mrb[4].mxu1 %v416_v22 }
 0x20a   : > { %v656_v32 = vpop.f32.mrb[0].mxu1 }
 0x20b   : > { %v657_v33 = vadd.f32 %v656_v32, %v455_v30  ;;  %v658_v34 = vpop.f32.mrb[1].mxu1 }
 0x20c   : > { %v659_v35 = vadd.f32 %v658_v34, %v459_v31  ;;  %v660_v36 = vpop.f32.mrb[2].mxu1 }
 0x20d   : > { %v661_v37 = vadd.f32 %v660_v36, %v455_v30  ;;  %v662_v38 = vpop.f32.mrb[3].mxu1  ;;  %v675_v40 = vmax.f32 %v657_v33, 0.0 }
 0x20e   : > { %v663_v39 = vadd.f32 %v662_v38, %v459_v31  ;;  %v676_v42 = vmax.f32 %v659_v35, 0.0 }
 0x20f   : > { %v677_v41 = vmax.f32 %v661_v37, 0.0 }
 0x210   : > { %v678_v43 = vmax.f32 %v663_v39, 0.0 }
 0x211   : > { %v683_v44 = vpack.c.bf16 %v677_v41, %v675_v40 }
 0x212   : > { %v684_v45 = vpack.c.bf16 %v678_v43, %v676_v42  ;;  %v666_v46 = vpop.f32.mrb[4].mxu1 }
 0x213   : > { %v667_v47 = vadd.f32 %v666_v46, %v455_v30  ;;  %v668_v48 = vpop.f32.mrb[5].mxu1 }
 0x214   : > { %v669_v49 = vadd.f32 %v668_v48, %v459_v31  ;;  %v670_v50 = vpop.f32.mrb[6].mxu1  ;;  %854 = vmatprep.mubr.bf16.mxu0 %v684_v45 }
 0x215   : > { %v671_v51 = vadd.f32 %v670_v50, %v455_v30  ;;  %v672_v52 = vpop.f32.mrb[7].mxu1  ;;  %855 = vmatmul.mubr.bf16.vlgmr.msra.gmra.mrb[8].mxu0 %v683_v44  ;;  %v679_v55 = vmax.f32 %v667_v47, 0.0 }
 0x216   : > { %v673_v54 = vadd.f32 %v672_v52, %v459_v31  ;;  %v680_v57 = vmax.f32 %v669_v49, 0.0 }
 0x217   : > { %v681_v56 = vmax.f32 %v671_v51, 0.0 }
 0x218   : > { %v682_v58 = vmax.f32 %v673_v54, 0.0 }
 0x219   : > { %v685_v59 = vpack.c.bf16 %v681_v56, %v679_v55 }
 0x21a   : > { %v686_v60 = vpack.c.bf16 %v682_v58, %v680_v57 }
 0x21c   : > { %862 = vmatprep.mubr.bf16.mxu0 %v686_v60 }
 0x21d   : > { %863 = vmatmul.mubr.bf16.gmra.mrb[12].mxu0 %v685_v59 }
 0x2e8   : > { %v1078_v61 = vpop.f32.mrb[8].mxu0 }
 0x2e9   : > { %v1079_v63 = vpop.f32.mrb[9].mxu0 }
 0x2ea   : > { %v1080_v0 = vadd.f32 %v1079_v63, %v1078_v61  ;;  %v1081_v1 = vpop.f32.mrb[10].mxu0 }
 0x2eb   : > { %v1082_v2 = vpop.f32.mrb[11].mxu0 }
 0x2ec   : > { %v857_v3 = vadd.f32 %v1080_v0, %v1039_v62  ;;  %v1083_v4 = vadd.f32 %v1082_v2, %v1081_v1 }
 0x2ee   : > { %1221 = vtanh.f32 %v857_v3  ;;  %v860_v5 = vadd.f32 %v1083_v4, %v1039_v62  ;;  %v878_v11 = vmax.f32 %v857_v3, -20.0 }
 0x2f0   : > { %1223 = vtanh.f32 %v860_v5  ;;  %v1084_v6 = vpop.f32.mrb[12].mxu0  ;;  %v879_v15 = vmax.f32 %v860_v5, -20.0  ;;  %v882_v17 = vmin.f32 %v878_v11, 2.0 }
 0x2f1   : > { %v1085_v7 = vpop.f32.mrb[13].mxu0 }
 0x2f2   : > { %v1086_v9 = vadd.f32 %v1085_v7, %v1084_v6  ;;  %v1087_v10 = vpop.f32.mrb[14].mxu0  ;;  %v883_v20 = vmin.f32 %v879_v15, 2.0 }
 0x2f3   : > { %v1088_v12 = vpop.f32.mrb[15].mxu0 }
 0x2f4   : > { %v865_v13 = vadd.f32 %v1086_v9, %v1039_v62  ;;  %v1089_v14 = vadd.f32 %v1088_v12, %v1087_v10 }
 0x2f6   : > { %1225 = vtanh.f32 %v865_v13  ;;  %v868_v16 = vadd.f32 %v1089_v14, %v1039_v62  ;;  %v880_v22 = vmax.f32 %v865_v13, -20.0 }
 0x2f8   : > { %v1222_v18 = vpop.eup %1221  ;;  %1227 = vtanh.f32 %v868_v16  ;;  %v881_v23 = vmax.f32 %v868_v16, -20.0  ;;  %v884_v24 = vmin.f32 %v880_v22, 2.0 }
 0x2f9   : > { %v886_v19 = vsel %vm873_vm2, %v1222_v18, %v882_v17 }
 0x2fa   : > { %v1224_v53 = vpop.eup %1223  ;;  %890 = vst [vmem:[%s302_s16] sm:$0xff] %v886_v19  ;;  %v885_v27 = vmin.f32 %v881_v23, 2.0 }
 0x2fb   : > { %v887_v21 = vsel %vm873_vm2, %v1224_v53, %v883_v20 }
 0x2fc   : > { %891 = vst [vmem:[%s302_s16 + $0x8] sm:$0xff] %v887_v21 }
 0x300   : > { %v1226_v25 = vpop.eup %1225 }
 0x301   : > { %v888_v26 = vsel %vm873_vm2, %v1226_v25, %v884_v24 }
 0x302   : > { %v1228_v28 = vpop.eup %1227  ;;  %892 = vst [vmem:[%s302_s16 + $0x10] sm:$0xff] %v888_v26 }
 0x303   : > { %v889_v29 = vsel %vm873_vm2, %v1228_v28, %v885_v27 }
 0x304   : > { %893 = vst [vmem:[%s302_s16 + $0x18] sm:$0xff] %v889_v29 }
 0x305   : > { %1298 = shalt.err (!%p1295_p11)
}
 0x306   : > { %s1299_s15 = scalar_lea.hbm %s1557_s22, 512  ;;  %s1303_s17 = scalar_lea.hbm %s1612_s7, 1024 }
 0x307   : > { %p1300_p13 = scmp.ne.s32.totalorder %s1557_s22, %s1299_s15  ;;  %p1304_p6 = scmp.lt.u32.totalorder %s1557_s22, %s1612_s7 }
 0x308   : > { %p1305_p9 = scmp.lt.u32.totalorder %s1303_s17, %s1299_s15  ;;  %p1307_p10 = scmp.lt.u32.totalorder %s1299_s15, %s1557_s22 }
 0x309   : > { %p1301_p0 = pnand %p1300_p13, %p1626_p1 }
 0x30a   : > { %p1306_p12 = por %p1305_p9, %p1304_p6 }
 0x30b   : > { %p1302_p5 = pneg %p1301_p0 }
 0x30c   : > { %p1308_p2 = por %p1307_p10, %p1306_p12 }
 0x30e   : > { %p1309_p3 = pnand %p1308_p2, %p1302_p5 }
 0x310   : > { %1312 = shalt.err (!%p1309_p3)
}
 0x311   : > { %s1365_s18 = smov 128   ;;  %s1366_s20 = smov 8  }
 0x312   : > { %1098 = dma.vmem_to_hbm [thread:$0]  (%p1626_p1), %s1559_s13, 512, %s1557_s22, %s1564_s28, %s1365_s18, %s1365_s18, %s1366_s20  }
 0x313 PF: > { %p1115_p4 = scmp.ge.s32.totalorder %s1355_s27, 2  ;;  %s923_s21 = sand.u32 1, %s1343_s24  }
 0x314   : > { %p1627_p7 = scmp.ne.s32.totalorder %s1618_s12, 0  ;;  %s924_s23 = scalar_lea.sflag [#allocation4], %s923_s21 }
 0x316   : > { %p1108_p8 = pnand %p1115_p4, %p1627_p7 }
 0x318   : > { %1338 = dma.done.wait (!%p1108_p8), %s924_s23, 512  }
 0x319   : > { %1340 = vsyncadd (!%p1108_p8), %s924_s23, 4294966784  ;;  %s1628_s29 = sld [smem:[#allocation11_spill]]  ;;  %p19_p11 = scmp.ge.s32.totalorder %s1432_s30, 4  }
 0x31a   : > { %s1629_s24 = smov %s1347_s25  ;;  %s1630_s25 = smov %s1351_s26 }
 0x31b   : > { %s1632_s27 = smov %s1432_s30  ;;  %21 = sbr.rel (!%p19_p11) target bundleno = 5 (0x5), region = 92 }
 0x31f   : > { %s1631_s26 = smov %s1628_s29 }
 0x322   :  { %929 = vsyncpa [#allocation3], 1 }
 0x323   :  { %931 = vsyncpa [#allocation3 + $0x1], 1 }
 0x324   :  { %932 = vsyncpa [#allocation6], 1 }
 0x325   :  { %933 = vsyncpa [#allocation4], 1 }
 0x326   :  { %935 = vsyncpa [#allocation4 + $0x1], 1 }

</bundles_post_ra>
